<compile_context>
chip_gen: v5e
topology: v5e:2x2
jax: 0.10.0
libtpu: 0.0.40
codegen_flags: <defaults>
</compile_context>

<pallas_src>
import functools

import jax
import jax.numpy as jnp
from jax import lax
from jax.experimental import pallas as pl
from jax.experimental.pallas import tpu as pltpu

# ---------------- model config (small, consistent with the module) -----------
SEQ_LEN = 8      # L
BATCH = 2        # N
EMBED_DIM = 32   # E
NUM_HEADS = 4    # H
HEAD_DIM = EMBED_DIM // NUM_HEADS   # Dh
LN_EPS = 1e-5


# ---------------- fused Pallas kernel -----------------------------------------
def _fused_mha_block_kernel(q_ref, k_ref, v_ref, w_in_ref, b_in_ref,
                            w_out_ref, b_out_ref, g_ref, beta_ref,
                            o_ref, attn_ref, *, N, H, Dh, scale):
    """Fused: Q/K/V proj -> masked per-head attention -> out_proj -> +value -> LN.

    q_ref/k_ref/v_ref: (NL, E)  rows in seq-major order, r = l*N + n
    w_in_ref:          (3E, E)  in_proj_weight (PyTorch layout, untouched)
    b_in_ref:          (3, E)   in_proj_bias reshaped
    w_out_ref:         (E, E)   out_proj weight (PyTorch layout, untouched)
    b_out_ref:         (1, E)   out_proj bias
    g_ref, beta_ref:   (1, E)   LayerNorm gamma / beta
    o_ref:             (NL, E)  output
    attn_ref:          (NL, E)  VMEM scratch for concatenated head outputs
    """
    E = H * Dh
    NL = q_ref.shape[0]

    xq = q_ref[...]
    xk = k_ref[...]
    xv = v_ref[...]                                   # also the residual input

    # Row slices of the (3E, E) in_proj weight: sublane-aligned -> free.
    wq = w_in_ref[0:E, :]
    wk = w_in_ref[E:2 * E, :]
    wv = w_in_ref[2 * E:3 * E, :]
    bq = b_in_ref[0:1, :]
    bk = b_in_ref[1:2, :]
    bv = b_in_ref[2:3, :]

    # Contract dim-1 of both operands => x @ W^T (PyTorch Linear), no transpose.
    dn = (((1,), (1,)), ((), ()))
    q2d = (lax.dot_general(xq, wq, dn, preferred_element_type=jnp.float32)
           + bq) * scale                                        # q-scaling incl. bias
    k2d = lax.dot_general(xk, wk, dn, preferred_element_type=jnp.float32) + bk
    v2d = lax.dot_general(xv, wv, dn, preferred_element_type=jnp.float32) + bv

    # Rows are interleaved (r = l*N + n): attend only within the same batch.
    row_b = lax.broadcasted_iota(jnp.int32, (NL, NL), 0) % N
    col_b = lax.broadcasted_iota(jnp.int32, (NL, NL), 1) % N
    same_batch = row_b == col_b
    neg_big = jnp.float32(-1e30)

    # Per-head attention covering BOTH batches per matmul (8 MXU pushes total).
    for h in range(H):
        c0, c1 = h * Dh, (h + 1) * Dh
        qh = q2d[:, c0:c1]                                       # (NL, Dh)
        kh = k2d[:, c0:c1]
        vh = v2d[:, c0:c1]
        s = lax.dot_general(qh, kh, dn,
                            preferred_element_type=jnp.float32)  # (NL, NL)
        s = jnp.where(same_batch, s, neg_big)
        m = jnp.max(s, axis=-1, keepdims=True)
        p = jnp.exp(s - m)                                       # masked -> 0
        l = jnp.sum(p, axis=-1, keepdims=True)
        pv = jnp.dot(p, vh, preferred_element_type=jnp.float32)  # (NL, Dh)
        # Deferred normalization: scale the small (NL,Dh) output, not (NL,NL).
        attn_ref[:, c0:c1] = pv * pl.reciprocal(l, approx=False)

    # --- out_proj + residual-on-value + LayerNorm -----------------------------
    attn = attn_ref[...]                                         # (NL, E)
    y = lax.dot_general(attn, w_out_ref[...], dn,
                        preferred_element_type=jnp.float32) + b_out_ref[...]
    r = xv + y                               # value + dropout1(attn_output)
    mu = jnp.mean(r, axis=-1, keepdims=True)
    var = jnp.mean((r - mu) ** 2, axis=-1, keepdims=True)
    norm = (r - mu) * lax.rsqrt(var + LN_EPS)
    o_ref[...] = norm * g_ref[...] + beta_ref[...]


# ---------------- wrapper ------------------------------------------------------
@jax.jit
def multi_head_attention_block(query, key, value, params):
    """Forward pass of MultiHeadAttentionBlock (eval mode).

    query/key/value: (L, N, E) float32.  Returns (L, N, E) float32.
    """
    L, N, E = query.shape
    H = NUM_HEADS
    Dh = E // H
    NL = L * N

    # Only FREE contiguous reshapes around the kernel (no transpose / concat).
    q2d = query.reshape(NL, E)
    k2d = key.reshape(NL, E)
    v2d = value.reshape(NL, E)
    b_in = params["in_proj_bias"].reshape(3, E)
    b_out = params["out_proj_bias"].reshape(1, E)
    gamma = params["ln_weight"].reshape(1, E)
    beta = params["ln_bias"].reshape(1, E)

    kernel = functools.partial(
        _fused_mha_block_kernel, N=N, H=H, Dh=Dh, scale=1.0 / (Dh ** 0.5))

    # Single fused kernel, no grid: total working set is a few KiB so every
    # operand is a full-array VMEM block on all of v5e/v6e/v7x.
    out2d = pl.pallas_call(
        kernel,
        out_shape=jax.ShapeDtypeStruct((NL, E), jnp.float32),
        scratch_shapes=[pltpu.VMEM((NL, E), jnp.float32)],
    )(q2d, k2d, v2d,
      params["in_proj_weight"], b_in,
      params["out_proj_weight"], b_out,
      gamma, beta)

    return out2d.reshape(L, N, E)


# ---------------- pure-JAX reference (for correctness check) ------------------
def reference_forward(query, key, value, params):
    L, N, E = query.shape
    H, Dh = NUM_HEADS, HEAD_DIM
    w_in, b_in = params["in_proj_weight"], params["in_proj_bias"]
    w_q, w_k, w_v = w_in[:E], w_in[E:2 * E], w_in[2 * E:]
    b_q, b_k, b_v = b_in[:E], b_in[E:2 * E], b_in[2 * E:]

    def proj(x, w, b):
        return x.reshape(L * N, E) @ w.T + b

    def heads(x2d):
        return x2d.reshape(L, N, H, Dh).transpose(1, 2, 0, 3).reshape(N * H, L, Dh)

    q = heads(proj(query, w_q, b_q))
    k = heads(proj(key, w_k, b_k))
    v = heads(proj(value, w_v, b_v))
    s = jnp.einsum("bld,bmd->blm", q, k) / (Dh ** 0.5)
    p = jax.nn.softmax(s, axis=-1)
    o = jnp.einsum("blm,bmd->bld", p, v)
    o2d = o.reshape(N, H, L, Dh).transpose(2, 0, 1, 3).reshape(L * N, E)
    y = o2d @ params["out_proj_weight"].T + params["out_proj_bias"]
    r = value.reshape(L * N, E) + y
    mu = r.mean(-1, keepdims=True)
    var = ((r - mu) ** 2).mean(-1, keepdims=True)
    out = (r - mu) / jnp.sqrt(var + LN_EPS) * params["ln_weight"] + params["ln_bias"]
    return out.reshape(L, N, E)


# ---------------- main ---------------------------------------------------------
if __name__ == "__main__":
    rng = jax.random.PRNGKey(0)
    k_q, k_k, k_v, k_w1, k_b1, k_w2, k_b2 = jax.random.split(rng, 7)

    E = EMBED_DIM
    query = jax.random.normal(k_q, (SEQ_LEN, BATCH, E), dtype=jnp.float32)
    key_in = jax.random.normal(k_k, (SEQ_LEN, BATCH, E), dtype=jnp.float32)
    value = jax.random.normal(k_v, (SEQ_LEN, BATCH, E), dtype=jnp.float32)

    # Deterministic synthetic parameters (shapes match nn.MultiheadAttention
    # + nn.LayerNorm inside the module).
    params = {
        "in_proj_weight": jax.random.normal(k_w1, (3 * E, E), jnp.float32) * 0.1,
        "in_proj_bias": jax.random.normal(k_b1, (3 * E,), jnp.float32) * 0.05,
        "out_proj_weight": jax.random.normal(k_w2, (E, E), jnp.float32) * 0.1,
        "out_proj_bias": jax.random.normal(k_b2, (E,), jnp.float32) * 0.05,
        "ln_weight": jnp.ones((E,), jnp.float32),
        "ln_bias": jnp.zeros((E,), jnp.float32),
    }

    out = multi_head_attention_block(query, key_in, value, params)
    out = jax.block_until_ready(out)

    ref = reference_forward(query, key_in, value, params)
    assert out.shape == (SEQ_LEN, BATCH, E)
    assert jnp.allclose(out, ref, atol=1e-4, rtol=1e-4), "mismatch vs reference"

    print("KERNEL_OK")
</pallas_src>

<mosaic_0001>
module attributes {stable_mosaic.version = 11 : i64} {
  func.func @_fused_mha_block_kernel(%arg0: memref<16x32xf32, #tpu.memory_space<vmem>>, %arg1: memref<16x32xf32, #tpu.memory_space<vmem>>, %arg2: memref<16x32xf32, #tpu.memory_space<vmem>>, %arg3: memref<96x32xf32, #tpu.memory_space<vmem>>, %arg4: memref<3x32xf32, #tpu.memory_space<vmem>>, %arg5: memref<32x32xf32, #tpu.memory_space<vmem>>, %arg6: memref<1x32xf32, #tpu.memory_space<vmem>>, %arg7: memref<1x32xf32, #tpu.memory_space<vmem>>, %arg8: memref<1x32xf32, #tpu.memory_space<vmem>>, %arg9: memref<16x32xf32, #tpu.memory_space<vmem>>, %arg10: memref<16x32xf32, #tpu.memory_space<vmem>>) attributes {dimension_semantics = [], scalar_prefetch = 0 : i64, scratch_operands = 1 : i64, tpu.core_type = #tpu.core_type<tc>} {
    %c0 = arith.constant 0 : index
    %c0_0 = arith.constant 0 : index
    %0 = vector.load %arg0[%c0, %c0_0] : memref<16x32xf32, #tpu.memory_space<vmem>>, vector<16x32xf32>
    %c0_1 = arith.constant 0 : index
    %c0_2 = arith.constant 0 : index
    %1 = vector.load %arg1[%c0_1, %c0_2] : memref<16x32xf32, #tpu.memory_space<vmem>>, vector<16x32xf32>
    %c0_3 = arith.constant 0 : index
    %c0_4 = arith.constant 0 : index
    %2 = vector.load %arg2[%c0_3, %c0_4] : memref<16x32xf32, #tpu.memory_space<vmem>>, vector<16x32xf32>
    %c0_5 = arith.constant 0 : index
    %c0_6 = arith.constant 0 : index
    %3 = vector.load %arg3[%c0_5, %c0_6] : memref<96x32xf32, #tpu.memory_space<vmem>>, vector<32x32xf32>
    %c32 = arith.constant 32 : index
    %c0_7 = arith.constant 0 : index
    %4 = vector.load %arg3[%c32, %c0_7] : memref<96x32xf32, #tpu.memory_space<vmem>>, vector<32x32xf32>
    %c64 = arith.constant 64 : index
    %c0_8 = arith.constant 0 : index
    %5 = vector.load %arg3[%c64, %c0_8] : memref<96x32xf32, #tpu.memory_space<vmem>>, vector<32x32xf32>
    %c0_9 = arith.constant 0 : index
    %c0_10 = arith.constant 0 : index
    %6 = vector.load %arg4[%c0_9, %c0_10] : memref<3x32xf32, #tpu.memory_space<vmem>>, vector<1x32xf32>
    %c1 = arith.constant 1 : index
    %c0_11 = arith.constant 0 : index
    %7 = vector.load %arg4[%c1, %c0_11] : memref<3x32xf32, #tpu.memory_space<vmem>>, vector<1x32xf32>
    %c2 = arith.constant 2 : index
    %c0_12 = arith.constant 0 : index
    %8 = vector.load %arg4[%c2, %c0_12] : memref<3x32xf32, #tpu.memory_space<vmem>>, vector<1x32xf32>
    %cst = arith.constant dense<0.000000e+00> : vector<16x32xf32>
    %9 = tpu.matmul %0, %3, %cst {dimension_numbers = #tpu.dot_dimension_numbers<[1], [1], [0], [0], [0, 0, 1, 0], [], []>} : vector<16x32xf32>, vector<32x32xf32>, vector<16x32xf32> -> vector<16x32xf32>
    %10 = vector.broadcast %6 : vector<1x32xf32> to vector<16x32xf32>
    %11 = arith.addf %9, %10 : vector<16x32xf32>
    %cst_13 = arith.constant 0.353553385 : f32
    %12 = vector.broadcast %cst_13 : f32 to vector<16x32xf32>
    %13 = arith.mulf %11, %12 : vector<16x32xf32>
    %cst_14 = arith.constant dense<0.000000e+00> : vector<16x32xf32>
    %14 = tpu.matmul %1, %4, %cst_14 {dimension_numbers = #tpu.dot_dimension_numbers<[1], [1], [0], [0], [0, 0, 1, 0], [], []>} : vector<16x32xf32>, vector<32x32xf32>, vector<16x32xf32> -> vector<16x32xf32>
    %15 = vector.broadcast %7 : vector<1x32xf32> to vector<16x32xf32>
    %16 = arith.addf %14, %15 : vector<16x32xf32>
    %cst_15 = arith.constant dense<0.000000e+00> : vector<16x32xf32>
    %17 = tpu.matmul %2, %5, %cst_15 {dimension_numbers = #tpu.dot_dimension_numbers<[1], [1], [0], [0], [0, 0, 1, 0], [], []>} : vector<16x32xf32>, vector<32x32xf32>, vector<16x32xf32> -> vector<16x32xf32>
    %18 = vector.broadcast %8 : vector<1x32xf32> to vector<16x32xf32>
    %19 = arith.addf %17, %18 : vector<16x32xf32>
    %20 = tpu.iota {dimensions = array<i32: 0>} : vector<16x16xi32>
    %c2_i32 = arith.constant 2 : i32
    %c0_i32 = arith.constant 0 : i32
    %21 = arith.cmpi eq, %c2_i32, %c0_i32 : i32
    %c1_i32 = arith.constant 1 : i32
    %22 = arith.select %21, %c1_i32, %c2_i32 : i32
    %23 = vector.broadcast %22 : i32 to vector<16x16xi32>
    %24 = arith.remsi %20, %23 : vector<16x16xi32>
    %c0_i32_16 = arith.constant 0 : i32
    %25 = vector.broadcast %c0_i32_16 : i32 to vector<16x16xi32>
    %26 = arith.cmpi ne, %24, %25 : vector<16x16xi32>
    %c0_i32_17 = arith.constant 0 : i32
    %27 = vector.broadcast %c0_i32_17 : i32 to vector<16x16xi32>
    %28 = arith.cmpi slt, %24, %27 : vector<16x16xi32>
    %c0_i32_18 = arith.constant 0 : i32
    %29 = arith.cmpi slt, %22, %c0_i32_18 : i32
    %30 = vector.broadcast %29 : i1 to vector<16x16xi1>
    %31 = vector.broadcast %30 : vector<16x16xi1> to vector<16x16xi1>
    %32 = arith.xori %28, %31 : vector<16x16xi1>
    %33 = arith.andi %32, %26 : vector<16x16xi1>
    %34 = vector.broadcast %22 : i32 to vector<16x16xi32>
    %35 = arith.addi %24, %34 : vector<16x16xi32>
    %36 = arith.select %33, %35, %24 : vector<16x16xi1>, vector<16x16xi32>
    %37 = tpu.iota {dimensions = array<i32: 1>} : vector<16x16xi32>
    %c2_i32_19 = arith.constant 2 : i32
    %c0_i32_20 = arith.constant 0 : i32
    %38 = arith.cmpi eq, %c2_i32_19, %c0_i32_20 : i32
    %c1_i32_21 = arith.constant 1 : i32
    %39 = arith.select %38, %c1_i32_21, %c2_i32_19 : i32
    %40 = vector.broadcast %39 : i32 to vector<16x16xi32>
    %41 = arith.remsi %37, %40 : vector<16x16xi32>
    %c0_i32_22 = arith.constant 0 : i32
    %42 = vector.broadcast %c0_i32_22 : i32 to vector<16x16xi32>
    %43 = arith.cmpi ne, %41, %42 : vector<16x16xi32>
    %c0_i32_23 = arith.constant 0 : i32
    %44 = vector.broadcast %c0_i32_23 : i32 to vector<16x16xi32>
    %45 = arith.cmpi slt, %41, %44 : vector<16x16xi32>
    %c0_i32_24 = arith.constant 0 : i32
    %46 = arith.cmpi slt, %39, %c0_i32_24 : i32
    %47 = vector.broadcast %46 : i1 to vector<16x16xi1>
    %48 = vector.broadcast %47 : vector<16x16xi1> to vector<16x16xi1>
    %49 = arith.xori %45, %48 : vector<16x16xi1>
    %50 = arith.andi %49, %43 : vector<16x16xi1>
    %51 = vector.broadcast %39 : i32 to vector<16x16xi32>
    %52 = arith.addi %41, %51 : vector<16x16xi32>
    %53 = arith.select %50, %52, %41 : vector<16x16xi1>, vector<16x16xi32>
    %54 = arith.cmpi eq, %36, %53 : vector<16x16xi32>
    %55 = vector.extract_strided_slice %13 {offsets = [0, 0], sizes = [16, 8], strides = [1, 1]} : vector<16x32xf32> to vector<16x8xf32>
    %56 = vector.extract_strided_slice %16 {offsets = [0, 0], sizes = [16, 8], strides = [1, 1]} : vector<16x32xf32> to vector<16x8xf32>
    %57 = vector.extract_strided_slice %19 {offsets = [0, 0], sizes = [16, 8], strides = [1, 1]} : vector<16x32xf32> to vector<16x8xf32>
    %cst_25 = arith.constant dense<0.000000e+00> : vector<16x16xf32>
    %58 = tpu.matmul %55, %56, %cst_25 {dimension_numbers = #tpu.dot_dimension_numbers<[1], [1], [0], [0], [0, 0, 1, 0], [], []>} : vector<16x8xf32>, vector<16x8xf32>, vector<16x16xf32> -> vector<16x16xf32>
    %cst_26 = arith.constant -1.000000e+30 : f32
    %59 = vector.broadcast %cst_26 : f32 to vector<16x16xf32>
    %60 = arith.select %54, %58, %59 : vector<16x16xi1>, vector<16x16xf32>
    %cst_27 = arith.constant dense<0xFF800000> : vector<16xf32>
    %61 = vector.multi_reduction <maximumf>, %60, %cst_27 [1] : vector<16x16xf32> to vector<16xf32>
    %62 = vector.shape_cast %61 : vector<16xf32> to vector<16x1xf32>
    %63 = vector.broadcast %62 : vector<16x1xf32> to vector<16x16xf32>
    %64 = arith.subf %60, %63 : vector<16x16xf32>
    %65 = math.exp %64 : vector<16x16xf32>
    %cst_28 = arith.constant dense<0.000000e+00> : vector<16xf32>
    %66 = vector.multi_reduction <add>, %65, %cst_28 [1] : vector<16x16xf32> to vector<16xf32>
    %67 = vector.shape_cast %66 : vector<16xf32> to vector<16x1xf32>
    %cst_29 = arith.constant dense<0.000000e+00> : vector<16x8xf32>
    %68 = tpu.matmul %65, %57, %cst_29 {dimension_numbers = #tpu.dot_dimension_numbers<[1], [0], [0], [1], [0, 0, 1, 1], [], []>} : vector<16x16xf32>, vector<16x8xf32>, vector<16x8xf32> -> vector<16x8xf32>
    %69 = tpu.reciprocal %67 : vector<16x1xf32> -> vector<16x1xf32>
    %70 = vector.broadcast %69 : vector<16x1xf32> to vector<16x8xf32>
    %71 = arith.mulf %68, %70 : vector<16x8xf32>
    %c0_30 = arith.constant 0 : index
    %c0_31 = arith.constant 0 : index
    %72 = vector.load %arg10[%c0_30, %c0_31] : memref<16x32xf32, #tpu.memory_space<vmem>>, vector<16x8xf32>
    tpu.vector_store %arg10[%c0_30, %c0_31], %71 {strides = array<i32>} : memref<16x32xf32, #tpu.memory_space<vmem>>, vector<16x8xf32>,
    %73 = vector.extract_strided_slice %13 {offsets = [0, 8], sizes = [16, 8], strides = [1, 1]} : vector<16x32xf32> to vector<16x8xf32>
    %74 = vector.extract_strided_slice %16 {offsets = [0, 8], sizes = [16, 8], strides = [1, 1]} : vector<16x32xf32> to vector<16x8xf32>
    %75 = vector.extract_strided_slice %19 {offsets = [0, 8], sizes = [16, 8], strides = [1, 1]} : vector<16x32xf32> to vector<16x8xf32>
    %cst_32 = arith.constant dense<0.000000e+00> : vector<16x16xf32>
    %76 = tpu.matmul %73, %74, %cst_32 {dimension_numbers = #tpu.dot_dimension_numbers<[1], [1], [0], [0], [0, 0, 1, 0], [], []>} : vector<16x8xf32>, vector<16x8xf32>, vector<16x16xf32> -> vector<16x16xf32>
    %cst_33 = arith.constant -1.000000e+30 : f32
    %77 = vector.broadcast %cst_33 : f32 to vector<16x16xf32>
    %78 = arith.select %54, %76, %77 : vector<16x16xi1>, vector<16x16xf32>
    %cst_34 = arith.constant dense<0xFF800000> : vector<16xf32>
    %79 = vector.multi_reduction <maximumf>, %78, %cst_34 [1] : vector<16x16xf32> to vector<16xf32>
    %80 = vector.shape_cast %79 : vector<16xf32> to vector<16x1xf32>
    %81 = vector.broadcast %80 : vector<16x1xf32> to vector<16x16xf32>
    %82 = arith.subf %78, %81 : vector<16x16xf32>
    %83 = math.exp %82 : vector<16x16xf32>
    %cst_35 = arith.constant dense<0.000000e+00> : vector<16xf32>
    %84 = vector.multi_reduction <add>, %83, %cst_35 [1] : vector<16x16xf32> to vector<16xf32>
    %85 = vector.shape_cast %84 : vector<16xf32> to vector<16x1xf32>
    %cst_36 = arith.constant dense<0.000000e+00> : vector<16x8xf32>
    %86 = tpu.matmul %83, %75, %cst_36 {dimension_numbers = #tpu.dot_dimension_numbers<[1], [0], [0], [1], [0, 0, 1, 1], [], []>} : vector<16x16xf32>, vector<16x8xf32>, vector<16x8xf32> -> vector<16x8xf32>
    %87 = tpu.reciprocal %85 : vector<16x1xf32> -> vector<16x1xf32>
    %88 = vector.broadcast %87 : vector<16x1xf32> to vector<16x8xf32>
    %89 = arith.mulf %86, %88 : vector<16x8xf32>
    %c0_37 = arith.constant 0 : index
    %c8 = arith.constant 8 : index
    %90 = vector.load %arg10[%c0_37, %c8] : memref<16x32xf32, #tpu.memory_space<vmem>>, vector<16x8xf32>
    tpu.vector_store %arg10[%c0_37, %c8], %89 {strides = array<i32>} : memref<16x32xf32, #tpu.memory_space<vmem>>, vector<16x8xf32>,
    %91 = vector.extract_strided_slice %13 {offsets = [0, 16], sizes = [16, 8], strides = [1, 1]} : vector<16x32xf32> to vector<16x8xf32>
    %92 = vector.extract_strided_slice %16 {offsets = [0, 16], sizes = [16, 8], strides = [1, 1]} : vector<16x32xf32> to vector<16x8xf32>
    %93 = vector.extract_strided_slice %19 {offsets = [0, 16], sizes = [16, 8], strides = [1, 1]} : vector<16x32xf32> to vector<16x8xf32>
    %cst_38 = arith.constant dense<0.000000e+00> : vector<16x16xf32>
    %94 = tpu.matmul %91, %92, %cst_38 {dimension_numbers = #tpu.dot_dimension_numbers<[1], [1], [0], [0], [0, 0, 1, 0], [], []>} : vector<16x8xf32>, vector<16x8xf32>, vector<16x16xf32> -> vector<16x16xf32>
    %cst_39 = arith.constant -1.000000e+30 : f32
    %95 = vector.broadcast %cst_39 : f32 to vector<16x16xf32>
    %96 = arith.select %54, %94, %95 : vector<16x16xi1>, vector<16x16xf32>
    %cst_40 = arith.constant dense<0xFF800000> : vector<16xf32>
    %97 = vector.multi_reduction <maximumf>, %96, %cst_40 [1] : vector<16x16xf32> to vector<16xf32>
    %98 = vector.shape_cast %97 : vector<16xf32> to vector<16x1xf32>
    %99 = vector.broadcast %98 : vector<16x1xf32> to vector<16x16xf32>
    %100 = arith.subf %96, %99 : vector<16x16xf32>
    %101 = math.exp %100 : vector<16x16xf32>
    %cst_41 = arith.constant dense<0.000000e+00> : vector<16xf32>
    %102 = vector.multi_reduction <add>, %101, %cst_41 [1] : vector<16x16xf32> to vector<16xf32>
    %103 = vector.shape_cast %102 : vector<16xf32> to vector<16x1xf32>
    %cst_42 = arith.constant dense<0.000000e+00> : vector<16x8xf32>
    %104 = tpu.matmul %101, %93, %cst_42 {dimension_numbers = #tpu.dot_dimension_numbers<[1], [0], [0], [1], [0, 0, 1, 1], [], []>} : vector<16x16xf32>, vector<16x8xf32>, vector<16x8xf32> -> vector<16x8xf32>
    %105 = tpu.reciprocal %103 : vector<16x1xf32> -> vector<16x1xf32>
    %106 = vector.broadcast %105 : vector<16x1xf32> to vector<16x8xf32>
    %107 = arith.mulf %104, %106 : vector<16x8xf32>
    %c0_43 = arith.constant 0 : index
    %c16 = arith.constant 16 : index
    %108 = vector.load %arg10[%c0_43, %c16] : memref<16x32xf32, #tpu.memory_space<vmem>>, vector<16x8xf32>
    tpu.vector_store %arg10[%c0_43, %c16], %107 {strides = array<i32>} : memref<16x32xf32, #tpu.memory_space<vmem>>, vector<16x8xf32>,
    %109 = vector.extract_strided_slice %13 {offsets = [0, 24], sizes = [16, 8], strides = [1, 1]} : vector<16x32xf32> to vector<16x8xf32>
    %110 = vector.extract_strided_slice %16 {offsets = [0, 24], sizes = [16, 8], strides = [1, 1]} : vector<16x32xf32> to vector<16x8xf32>
    %111 = vector.extract_strided_slice %19 {offsets = [0, 24], sizes = [16, 8], strides = [1, 1]} : vector<16x32xf32> to vector<16x8xf32>
    %cst_44 = arith.constant dense<0.000000e+00> : vector<16x16xf32>
    %112 = tpu.matmul %109, %110, %cst_44 {dimension_numbers = #tpu.dot_dimension_numbers<[1], [1], [0], [0], [0, 0, 1, 0], [], []>} : vector<16x8xf32>, vector<16x8xf32>, vector<16x16xf32> -> vector<16x16xf32>
    %cst_45 = arith.constant -1.000000e+30 : f32
    %113 = vector.broadcast %cst_45 : f32 to vector<16x16xf32>
    %114 = arith.select %54, %112, %113 : vector<16x16xi1>, vector<16x16xf32>
    %cst_46 = arith.constant dense<0xFF800000> : vector<16xf32>
    %115 = vector.multi_reduction <maximumf>, %114, %cst_46 [1] : vector<16x16xf32> to vector<16xf32>
    %116 = vector.shape_cast %115 : vector<16xf32> to vector<16x1xf32>
    %117 = vector.broadcast %116 : vector<16x1xf32> to vector<16x16xf32>
    %118 = arith.subf %114, %117 : vector<16x16xf32>
    %119 = math.exp %118 : vector<16x16xf32>
    %cst_47 = arith.constant dense<0.000000e+00> : vector<16xf32>
    %120 = vector.multi_reduction <add>, %119, %cst_47 [1] : vector<16x16xf32> to vector<16xf32>
    %121 = vector.shape_cast %120 : vector<16xf32> to vector<16x1xf32>
    %cst_48 = arith.constant dense<0.000000e+00> : vector<16x8xf32>
    %122 = tpu.matmul %119, %111, %cst_48 {dimension_numbers = #tpu.dot_dimension_numbers<[1], [0], [0], [1], [0, 0, 1, 1], [], []>} : vector<16x16xf32>, vector<16x8xf32>, vector<16x8xf32> -> vector<16x8xf32>
    %123 = tpu.reciprocal %121 : vector<16x1xf32> -> vector<16x1xf32>
    %124 = vector.broadcast %123 : vector<16x1xf32> to vector<16x8xf32>
    %125 = arith.mulf %122, %124 : vector<16x8xf32>
    %c0_49 = arith.constant 0 : index
    %c24 = arith.constant 24 : index
    %126 = vector.load %arg10[%c0_49, %c24] : memref<16x32xf32, #tpu.memory_space<vmem>>, vector<16x8xf32>
    tpu.vector_store %arg10[%c0_49, %c24], %125 {strides = array<i32>} : memref<16x32xf32, #tpu.memory_space<vmem>>, vector<16x8xf32>,
    %c0_50 = arith.constant 0 : index
    %c0_51 = arith.constant 0 : index
    %127 = vector.load %arg10[%c0_50, %c0_51] : memref<16x32xf32, #tpu.memory_space<vmem>>, vector<16x32xf32>
    %c0_52 = arith.constant 0 : index
    %c0_53 = arith.constant 0 : index
    %128 = vector.load %arg5[%c0_52, %c0_53] : memref<32x32xf32, #tpu.memory_space<vmem>>, vector<32x32xf32>
    %cst_54 = arith.constant dense<0.000000e+00> : vector<16x32xf32>
    %129 = tpu.matmul %127, %128, %cst_54 {dimension_numbers = #tpu.dot_dimension_numbers<[1], [1], [0], [0], [0, 0, 1, 0], [], []>} : vector<16x32xf32>, vector<32x32xf32>, vector<16x32xf32> -> vector<16x32xf32>
    %c0_55 = arith.constant 0 : index
    %c0_56 = arith.constant 0 : index
    %130 = vector.load %arg6[%c0_55, %c0_56] : memref<1x32xf32, #tpu.memory_space<vmem>>, vector<1x32xf32>
    %131 = vector.broadcast %130 : vector<1x32xf32> to vector<16x32xf32>
    %132 = arith.addf %129, %131 : vector<16x32xf32>
    %133 = arith.addf %2, %132 : vector<16x32xf32>
    %cst_57 = arith.constant dense<0.000000e+00> : vector<16xf32>
    %134 = vector.multi_reduction <add>, %133, %cst_57 [1] : vector<16x32xf32> to vector<16xf32>
    %135 = vector.shape_cast %134 : vector<16xf32> to vector<16x1xf32>
    %cst_58 = arith.constant 3.200000e+01 : f32
    %136 = vector.broadcast %cst_58 : f32 to vector<16x1xf32>
    %137 = arith.divf %135, %136 : vector<16x1xf32>
    %138 = vector.broadcast %137 : vector<16x1xf32> to vector<16x32xf32>
    %139 = arith.subf %133, %138 : vector<16x32xf32>
    %140 = arith.mulf %139, %139 : vector<16x32xf32>
    %cst_59 = arith.constant dense<0.000000e+00> : vector<16xf32>
    %141 = vector.multi_reduction <add>, %140, %cst_59 [1] : vector<16x32xf32> to vector<16xf32>
    %142 = vector.shape_cast %141 : vector<16xf32> to vector<16x1xf32>
    %cst_60 = arith.constant 3.200000e+01 : f32
    %143 = vector.broadcast %cst_60 : f32 to vector<16x1xf32>
    %144 = arith.divf %142, %143 : vector<16x1xf32>
    %145 = vector.broadcast %137 : vector<16x1xf32> to vector<16x32xf32>
    %146 = arith.subf %133, %145 : vector<16x32xf32>
    %cst_61 = arith.constant 9.99999974E-6 : f32
    %147 = vector.broadcast %cst_61 : f32 to vector<16x1xf32>
    %148 = arith.addf %144, %147 : vector<16x1xf32>
    %149 = math.rsqrt %148 : vector<16x1xf32>
    %150 = vector.broadcast %149 : vector<16x1xf32> to vector<16x32xf32>
    %151 = arith.mulf %146, %150 : vector<16x32xf32>
    %c0_62 = arith.constant 0 : index
    %c0_63 = arith.constant 0 : index
    %152 = vector.load %arg7[%c0_62, %c0_63] : memref<1x32xf32, #tpu.memory_space<vmem>>, vector<1x32xf32>
    %153 = vector.broadcast %152 : vector<1x32xf32> to vector<16x32xf32>
    %154 = arith.mulf %151, %153 : vector<16x32xf32>
    %c0_64 = arith.constant 0 : index
    %c0_65 = arith.constant 0 : index
    %155 = vector.load %arg8[%c0_64, %c0_65] : memref<1x32xf32, #tpu.memory_space<vmem>>, vector<1x32xf32>
    %156 = vector.broadcast %155 : vector<1x32xf32> to vector<16x32xf32>
    %157 = arith.addf %154, %156 : vector<16x32xf32>
    %c0_66 = arith.constant 0 : index
    %c0_67 = arith.constant 0 : index
    %158 = vector.load %arg9[%c0_66, %c0_67] : memref<16x32xf32, #tpu.memory_space<vmem>>, vector<16x32xf32>
    tpu.vector_store %arg9[%c0_66, %c0_67], %157 {strides = array<i32>} : memref<16x32xf32, #tpu.memory_space<vmem>>, vector<16x32xf32>,
    return
  }
}

</mosaic_0001>

<bundles_post_ra>
// kernel: multi_head_attention_block.1
= control target key start
LH: loop header
LB: loop body
LE: loop exit
PB: predicated region body
PF: predicated region fallthrough
CT: control target
= control target key end

     0   :  { %vm55_vm0 = vcmask 261120   ;;  %s1316_s0 = inlined_call_operand.vmem [shape: f32[16,32], index: 0, kind: input, shape index: {}]   ;;  %s1317_s1 = inlined_call_operand.vmem [shape: f32[16,32], index: 1, kind: input, shape index: {}]   ;;  %s1318_s2 = inlined_call_operand.vmem [shape: f32[16,32], index: 2, kind: input, shape index: {}]   ;;  %s1319_s3 = inlined_call_operand.vmem [shape: f32[96,32], index: 3, kind: input, shape index: {}]   ;;  %s1320_s4 = inlined_call_operand.vmem [shape: f32[3,32], index: 4, kind: input, shape index: {}]   ;;  %s1321_s5 = inlined_call_operand.vmem [shape: f32[32,32], index: 5, kind: input, shape index: {}]   ;;  %s1322_s6 = inlined_call_operand.vmem [shape: f32[1,32], index: 6, kind: input, shape index: {}]   ;;  %s1323_s7 = inlined_call_operand.vmem [shape: f32[1,32], index: 7, kind: input, shape index: {}]   ;;  %s1324_s8 = inlined_call_operand.vmem [shape: f32[1,32], index: 8, kind: input, shape index: {}]   ;;  %s1325_s9 = inlined_call_operand.hbm [shape: f32[16,32], index: 9, kind: output, shape index: {}]  }
   0x1   :  { %v46_v0 = vld [vmem:[%s1319_s3 + $0x38] sm:$0xff]  ;;  %v45_v2 = vld [vmem:[%s1319_s3 + $0x30] sm:$0xff]  ;;  %v44_v5 = vld [vmem:[%s1319_s3 + $0x28] sm:$0xff] }
   0x2   :  { %v42_v1 = vld [vmem:[%s1319_s3 + $0x18] sm:$0xff]  ;;  %893 = vmatpush.xpose.msk.msra.mxu1 %vm55_vm0, %v46_v0  ;;  %v41_v3 = vld [vmem:[%s1319_s3 + $0x10] sm:$0xff]  ;;  %v40_v6 = vld [vmem:[%s1319_s3 + $0x8] sm:$0xff] }
   0x3   :  { %887 = vmatpush.xpose.msk.msra.mxu0 %vm55_vm0, %v42_v1  ;;  %v50_v4 = vld [vmem:[%s1319_s3 + $0x58] sm:$0xff]  ;;  %v49_v7 = vld [vmem:[%s1319_s3 + $0x50] sm:$0xff] }
   0x4   :  { %899 = vmatpush.xpose.msk.msra.mxu2 %vm55_vm0, %v50_v4 }
   0x6   :  { %894 = vmatpush.xpose.msk.msra.mxu1 %vm55_vm0, %v45_v2 }
   0x7   :  { %888 = vmatpush.xpose.msk.msra.mxu0 %vm55_vm0, %v41_v3 }
   0x8   :  { %14 = vsyncpa [#allocation4], 0  ;;  %v43_v8 = vld [vmem:[%s1319_s3 + $0x20] sm:$0xff]  ;;  %900 = vmatpush.xpose.msk.msra.mxu2 %vm55_vm0, %v49_v7  ;;  %v48_v10 = vld [vmem:[%s1319_s3 + $0x48] sm:$0xff]  ;;  %s1029_s25 = smov 112   ;;  %s1030_s26 = smov 120   ;;  %v183_v42 = vlaneseq }
   0x9   :  { %v39_v9 = vld [vmem:[%s1319_s3] sm:$0xff]  ;;  %v36_v15 = vld [vmem:[%s1317_s1 + $0x8] sm:$0xff]  ;;  %vm226_vm1 = vcmask 64512   ;;  %vm264_vm3 = vcmask 130048   ;;  %s1033_s29 = smov 16   ;;  %s1034_s30 = smov 24  }
   0xa   :  { %895 = vmatpush.xpose.msk.msra.mxu1 %vm55_vm0, %v44_v5  ;;  %v35_v11 = vld [vmem:[%s1317_s1] sm:$0xff]  ;;  %v34_v16 = vld [vmem:[%s1316_s0 + $0x8] sm:$0xff]  ;;  %v184_v44 = vshrl.u32 %v183_v42, 7  ;;  %v211_v45 = vand.u32 127, %v183_v42  ;;  %s1037_s23 = smov 128  }
   0xb   :  { %889 = vmatpush.xpose.msk.msra.mxu0 %vm55_vm0, %v40_v6  ;;  %v33_v12 = vld [vmem:[%s1316_s0] sm:$0xff]  ;;  %v1162_v17 = vld [vmem:[%s1318_s2 + $0x8] sm:$0xff] }
   0xc   :  { %901 = vmatpush.xpose.msk.msra.mxu2 %vm55_vm0, %v48_v10  ;;  %v47_v13 = vld [vmem:[%s1319_s3 + $0x40] sm:$0xff]  ;;  %v190_v47 = vand.u32 1, %v184_v44  ;;  %v216_v48 = vand.u32 1, %v211_v45  ;;  %v185_v50 = vadd.s32 8, %v184_v44 }
   0xd   :  { %v1147_v14 = vld [vmem:[%s1318_s2] sm:$0xff]  ;;  %s1031_s2 = smov 104  }
   0xe   :  { %896 = vmatpush.xpose.msk.msra.mxu1 %vm55_vm0, %v43_v8  ;;  %v959_v18 = vld [vmem:[%s1320_s4 + $0x1] ss:$0 sm:$0xff]  ;;  %v960_v20 = vld [vmem:[%s1320_s4] ss:$0 sm:$0xff]  ;;  %v961_v31 = vld [vmem:[%s1320_s4 + $0x2] ss:$0 sm:$0xff]  ;;  %vm1203_vm2 = vcmp.eq.s32.totalorder %v190_v47, %v216_v48 }
   0xf   :  { %890 = vmatpush.xpose.msk.msra.mxu0 %vm55_vm0, %v39_v9  ;;  %v197_v56 = vand.u32 1, %v185_v50  ;;  %s1032_s4 = smov 8  }
  0x10   :  { %902 = vmatpush.xpose.msk.msra.mxu2 %vm55_vm0, %v47_v13 }
  0x11   :  { %897 = vmatmul.msk.f32.vlgmr.msra.gmra.mxu1 %vm55_vm0, %v35_v11  ;;  %vm1213_vm4 = vcmp.eq.s32.totalorder %v197_v56, %v216_v48 }
  0x12   :  { %891 = vmatmul.msk.f32.vlgmr.msra.gmra.mxu0 %vm55_vm0, %v33_v12 }
  0x13   :  { %903 = vmatmul.msk.f32.vlgmr.msra.gmra.mxu2 %vm55_vm0, %v1147_v14 }
  0x19   :  { %898 = vmatmul.msk.f32.gmra.mxu1 %vm55_vm0, %v36_v15 }
  0x1a   :  { %892 = vmatmul.msk.f32.gmra.mxu0 %vm55_vm0, %v34_v16 }
  0x1b   :  { %904 = vmatmul.msk.f32.gmra.mxu2 %vm55_vm0, %v1162_v17 }
  0x8e   :  { %v135_v19 = vpop.f32.mrf.mxu1 }
  0x8f   :  { %v136_v21 = vadd.f32 %v959_v18, %v135_v19  ;;  %v91_v22 = vpop.f32.mrf.mxu0 }
  0x90   :  { %v92_v23 = vadd.f32 %v960_v20, %v91_v22 }
  0x91   :  { %485 = vrot.lane.b32.xlu2 %v136_v21, %s1029_s25  ;;  %348 = vrot.lane.b32.xlu1 %v136_v21, %s1030_s26 }
  0x92   :  { %v97_v24 = vmul.f32 0.35355338, %v92_v23 }
  0x96   :  { %v138_v25 = vpop.f32.mrf.mxu1  ;;  %v177_v30 = vpop.f32.mrf.mxu2 }
  0x97   :  { %v139_v26 = vadd.f32 %v959_v18, %v138_v25  ;;  %v94_v27 = vpop.f32.mrf.mxu0  ;;  %v178_v32 = vadd.f32 %v961_v31, %v177_v30 }
  0x98   :  { %v95_v28 = vadd.f32 %v960_v20, %v94_v27 }
  0x99   :  { %350 = vrot.lane.b32.xlu0 %v139_v26, %s1030_s26  ;;  %905 = vmatpush.xpose.msk.msra.mxu3 %vm226_vm1, %v139_v26 }
  0x9a   :  { %344 = vrot.lane.b32.xlu1 %v97_v24, %s1030_s26  ;;  %481 = vrot.lane.b32.xlu2 %v97_v24, %s1029_s25  ;;  %v98_v29 = vmul.f32 0.35355338, %v95_v28 }
  0x9d   :  { %906 = vmatpush.xpose.msk.msra.mxu3 %vm226_vm1, %v136_v21 }
  0x9e   :  { %v180_v33 = vpop.f32.mrf.mxu2 }
  0x9f   :  { %v181_v34 = vadd.f32 %v961_v31, %v180_v33 }
  0xa0   :  { %907 = vmatmul.msk.f32.vlgmr.msra.gmra.mxu3 %vm226_vm1, %v97_v24 }
  0xa1   :  { %487 = vrot.lane.b32.xlu0 %v139_v26, %s1029_s25  ;;  %v1191_v35 = vpack.i.bf16 %v178_v32, %v181_v34  ;;  %303 = vmatpush.msrb.mxu3 %v181_v34 }
  0xa2   :  { %622 = vrot.lane.b32.xlu1 %v139_v26, %s1031_s2  ;;  %483 = vrot.lane.b32.xlu2 %v98_v29, %s1029_s25 }
  0xa3   :  { %304 = vmatpush.msrb.mxu3 %v178_v32 }
  0xa8   :  { %908 = vmatmul.msk.f32.gmra.mxu3 %vm226_vm1, %v98_v29 }
  0xa9   :  { %346 = vrot.lane.b32.xlu0 %v98_v29, %s1030_s26 }
  0xaa   :  { %616 = vrot.lane.b32.xlu1 %v97_v24, %s1031_s2  ;;  %618 = vrot.lane.b32.xlu2 %v98_v29, %s1031_s2 }
  0xb1   :  { %620 = vrot.lane.b32.xlu0 %v136_v21, %s1031_s2 }
  0xb9   :  { %945 = vrot.lane.b32.xlu0 %v1191_v35, %s1030_s26 }
  0xeb   :  { %v486_v39 = vpop.permute.xlu2 %485 }
  0xf4   :  { %v482_v43 = vpop.permute.xlu2 %481 }
  0xfc   :  { %v484_v51 = vpop.permute.xlu2 %483 }
 0x103   :  { %v349_v36 = vpop.permute.xlu1 %348 }
 0x104   :  { %v619_v62 = vpop.permute.xlu2 %618 }
 0x10b   :  { %v351_v37 = vpop.permute.xlu0 %350 }
 0x10c   :  { %v345_v38 = vpop.permute.xlu1 %344  ;;  %911 = vmatpush.xpose.msk.msrb.mxu0 %vm226_vm1, %v351_v37 }
 0x110   :  { %912 = vmatpush.xpose.msk.msrb.mxu0 %vm226_vm1, %v349_v36 }
 0x113   :  { %v488_v40 = vpop.permute.xlu0 %487  ;;  %913 = vmatmul.msk.f32.vlgmr.msrb.gmra.mxu0 %vm226_vm1, %v345_v38 }
 0x114   :  { %v623_v41 = vpop.permute.xlu1 %622  ;;  %917 = vmatpush.xpose.msk.msrb.mxu2 %vm226_vm1, %v488_v40 }
 0x115   :  { %923 = vmatpush.xpose.msk.msra.mxu0 %vm226_vm1, %v623_v41 }
 0x118   :  { %918 = vmatpush.xpose.msk.msrb.mxu2 %vm226_vm1, %v486_v39 }
 0x11b   :  { %v347_v46 = vpop.permute.xlu0 %346  ;;  %919 = vmatmul.msk.f32.vlgmr.msrb.gmra.mxu2 %vm226_vm1, %v482_v43 }
 0x11c   :  { %914 = vmatmul.msk.f32.gmra.mxu0 %vm226_vm1, %v347_v46  ;;  %v617_v57 = vpop.permute.xlu1 %616 }
 0x123   :  { %v621_v52 = vpop.permute.xlu0 %620  ;;  %v256_v53 = vpop.f32.mrf.mxu3  ;;  %920 = vmatmul.msk.f32.gmra.mxu2 %vm226_vm1, %v484_v51 }
 0x124   :  { %v262_v54 = vsel %vm1203_vm2, %v256_v53, -1e+30  ;;  %924 = vmatpush.xpose.msk.msra.mxu0 %vm226_vm1, %v621_v52 }
 0x125   :  { %v265_v55 = vsel %vm264_vm3, %v262_v54, -inf }
 0x126   :  { %266 = vmax.xlane.f32.xlu0 %v265_v55 }
 0x127   :  { %925 = vmatmul.msk.f32.vlgmr.msra.gmra.mxu0 %vm226_vm1, %v617_v57 }
 0x12b   :  { %v259_v59 = vpop.f32.mrf.mxu3  ;;  %v946_v63 = vpop.permute.xlu0 %945 }
 0x12c   :  { %v263_v60 = vsel %vm1213_vm4, %v259_v59, -1e+30  ;;  %v947_v11 = vunpack.i.l.bf16 %v946_v63  ;;  %v948_v12 = vunpack.i.h.bf16 %v946_v63 }
 0x12d   :  { %v268_v61 = vsel %vm264_vm3, %v263_v60, -inf }
 0x12e   :  { %269 = vmax.xlane.f32.xlu2 %v268_v61  ;;  %431 = vmatpush.msrb.mxu1 %v947_v11 }
 0x12f   :  { %926 = vmatmul.msk.f32.gmra.mxu0 %vm226_vm1, %v619_v62 }
 0x130   :  { %432 = vmatpush.msrb.mxu1 %v948_v12 }
 0x13a   :  { %955 = vrot.lane.b32.xlu0 %v1191_v35, %s1031_s2 }
 0x190   :  { %v377_v0 = vpop.f32.mrf.mxu0 }
 0x191   :  { %v383_v1 = vsel %vm1203_vm2, %v377_v0, -1e+30 }
 0x192   :  { %v385_v2 = vsel %vm264_vm3, %v383_v1, -inf }
 0x193   :  { %386 = vmax.xlane.f32.xlu1 %v385_v2 }
 0x199   :  { %v380_v3 = vpop.f32.mrf.mxu0  ;;  %v267_v4 = vpop.xlane.xlu0 %266 }
 0x19a   :  { %v384_v5 = vsel %vm1213_vm4, %v380_v3, -1e+30  ;;  %v271_v6 = vsub.f32 %v262_v54, %v267_v4 }
 0x19b   :  { %v388_v7 = vsel %vm264_vm3, %v384_v5, -inf }
 0x19c   :  { %v273_v8 = vmul.f32 1.442695, %v271_v6  ;;  %389 = vmax.xlane.f32.xlu2 %v388_v7 }
 0x19e   :  { %965 = vpow2.f32 %v273_v8  ;;  %v514_v9 = vpop.f32.mrf.mxu2 }
 0x19f   :  { %v520_v10 = vsel %vm1203_vm2, %v514_v9, -1e+30 }
 0x1a0   :  { %v522_v13 = vsel %vm264_vm3, %v520_v10, -inf }
 0x1a1   :  { %523 = vmax.xlane.f32.xlu1 %v522_v13  ;;  %v270_v15 = vpop.xlane.xlu2 %269 }
 0x1a2   :  { %v272_v16 = vsub.f32 %v263_v60, %v270_v15 }
 0x1a4   :  { %v966_v18 = vpop.eup %965  ;;  %v275_v19 = vmul.f32 1.442695, %v272_v16  ;;  %v649_v20 = vpop.f32.mrf.mxu0 }
 0x1a5   :  { %v655_v21 = vsel %vm1203_vm2, %v649_v20, -1e+30  ;;  %909 = vmatmul.msk.f32.vlgmr.msrb.gmra.mxu3 %vm264_vm3, %v966_v18  ;;  %v277_v46 = vsel %vm264_vm3, %v966_v18, 0.0 }
 0x1a6   :  { %967 = vpow2.f32 %v275_v19  ;;  %v517_v22 = vpop.f32.mrf.mxu2  ;;  %v657_v23 = vsel %vm264_vm3, %v655_v21, -inf }
 0x1a7   :  { %v521_v24 = vsel %vm1213_vm4, %v517_v22, -1e+30  ;;  %658 = vmax.xlane.f32.xlu2 %v657_v23 }
 0x1a8   :  { %v525_v25 = vsel %vm264_vm3, %v521_v24, -inf }
 0x1a9   :  { %526 = vmax.xlane.f32.xlu1 %v525_v25 }
 0x1ac   :  { %v1239_v26 = vpop.eup %967  ;;  %v652_v27 = vpop.f32.mrf.mxu0 }
 0x1ad   :  { %v956_v28 = vpop.permute.xlu0 %955  ;;  %v656_v29 = vsel %vm1213_vm4, %v652_v27, -1e+30  ;;  %910 = vmatmul.msk.f32.gmra.mxu3 %vm264_vm3, %v1239_v26  ;;  %v280_v3 = vsel %vm264_vm3, %v1239_v26, 0.0 }
 0x1ae   :  { %v958_v30 = vunpack.i.h.bf16 %v956_v28  ;;  %v957_v31 = vunpack.i.l.bf16 %v956_v28  ;;  %v660_v32 = vsel %vm264_vm3, %v656_v29, -inf }
 0x1b0   :  { %701 = vmatpush.msra.mxu1 %v957_v31 }
 0x1b1   :  { %661 = vmax.xlane.f32.xlu1 %v660_v32 }
 0x1b2   :  { %702 = vmatpush.msra.mxu1 %v958_v30 }
 0x1bf   :  { %950 = vrot.lane.b32.xlu2 %v1191_v35, %s1029_s25 }
 0x206   :  { %v387_v33 = vpop.xlane.xlu1 %386 }
 0x207   :  { %v391_v34 = vsub.f32 %v383_v1, %v387_v33 }
 0x209   :  { %v393_v36 = vmul.f32 1.442695, %v391_v34 }
 0x20b   :  { %969 = vpow2.f32 %v393_v36 }
 0x20f   :  { %v390_v37 = vpop.xlane.xlu2 %389 }
 0x210   :  { %v392_v38 = vsub.f32 %v384_v5, %v390_v37 }
 0x211   :  { %v970_v39 = vpop.eup %969 }
 0x212   :  { %v395_v40 = vmul.f32 1.442695, %v392_v38  ;;  %915 = vmatmul.msk.f32.vlgmr.msrb.gmra.mxu1 %vm264_vm3, %v970_v39  ;;  %v397_v41 = vsel %vm264_vm3, %v970_v39, 0.0 }
 0x213   :  { %398 = vadd.xlane.f32.xlu1 %v397_v41 }
 0x214   :  { %971 = vpow2.f32 %v395_v40  ;;  %v524_v42 = vpop.xlane.xlu1 %523 }
 0x215   :  { %v528_v43 = vsub.f32 %v520_v10, %v524_v42 }
 0x217   :  { %v530_v44 = vmul.f32 1.442695, %v528_v43 }
 0x219   :  { %973 = vpow2.f32 %v530_v44 }
 0x21a   :  { %v972_v45 = vpop.eup %971  ;;  %v659_v35 = vpop.xlane.xlu2 %658 }
 0x21b   :  { %v663_v47 = vsub.f32 %v655_v21, %v659_v35  ;;  %278 = vadd.xlane.f32.xlu1 %v277_v46  ;;  %916 = vmatmul.msk.f32.gmra.mxu1 %vm264_vm3, %v972_v45  ;;  %v400_v48 = vsel %vm264_vm3, %v972_v45, 0.0 }
 0x21c   :  { %v527_v49 = vpop.xlane.xlu1 %526  ;;  %401 = vadd.xlane.f32.xlu2 %v400_v48 }
 0x21d   :  { %v665_v50 = vmul.f32 1.442695, %v663_v47  ;;  %v529_v51 = vsub.f32 %v521_v24, %v527_v49 }
 0x21f   :  { %v974_v52 = vpop.eup %973  ;;  %975 = vpow2.f32 %v665_v50  ;;  %v532_v53 = vmul.f32 1.442695, %v529_v51 }
 0x220   :  { %v534_v54 = vsel %vm264_vm3, %v974_v52, 0.0 }
 0x221   :  { %977 = vpow2.f32 %v532_v53  ;;  %535 = vadd.xlane.f32.xlu0 %v534_v54 }
 0x222   :  { %v951_v55 = vpop.permute.xlu2 %950 }
 0x223   :  { %v952_v56 = vunpack.i.l.bf16 %v951_v55  ;;  %v953_v59 = vunpack.i.h.bf16 %v951_v55 }
 0x224   :  { %v662_v57 = vpop.xlane.xlu1 %661 }
 0x225   :  { %v976_v58 = vpop.eup %975  ;;  %v664_v60 = vsub.f32 %v656_v29, %v662_v57  ;;  %566 = vmatpush.msra.mxu3 %v952_v56 }
 0x226   :  { %927 = vmatmul.msk.f32.vlgmr.msra.gmra.mxu1 %vm264_vm3, %v976_v58  ;;  %v669_v1 = vsel %vm264_vm3, %v976_v58, 0.0 }
 0x227   :  { %v978_v61 = vpop.eup %977  ;;  %v667_v62 = vmul.f32 1.442695, %v664_v60  ;;  %567 = vmatpush.msra.mxu3 %v953_v59 }
 0x228   :  { %921 = vmatmul.msk.f32.vlgmr.msra.gmra.mxu3 %vm264_vm3, %v974_v52  ;;  %v537_v63 = vsel %vm264_vm3, %v978_v61, 0.0  ;;  %v306_v27 = vpop.f32.mrf.mxu3 }
 0x229   :  { %979 = vpow2.f32 %v667_v62  ;;  %538 = vadd.xlane.f32.xlu1 %v537_v63 }
 0x22f   :  { %v980_v0 = vpop.eup %979 }
 0x230   :  { %922 = vmatmul.msk.f32.gmra.mxu3 %vm264_vm3, %v978_v61  ;;  %928 = vmatmul.msk.f32.gmra.mxu1 %vm264_vm3, %v980_v0  ;;  %v672_v2 = vsel %vm264_vm3, %v980_v0, 0.0  ;;  %v1269_v52 = vpop.f32.mrf.mxu3 }
 0x231   :  { %670 = vadd.xlane.f32.xlu1 %v669_v1 }
 0x239   :  { %673 = vadd.xlane.f32.xlu1 %v672_v2 }
 0x241   :  { %281 = vadd.xlane.f32.xlu1 %v280_v3 }
 0x286   :  { %v399_v4 = vpop.xlane.xlu1 %398 }
 0x287   :  { %981 = vrcp.f32 %v399_v4  ;;  %v451_v10 = vand.u32 2147483648, %v399_v4  ;;  %v449_v12 = vand.u32 2147483647, %v399_v4  ;;  %vm445_vm6 = vweird.f32 %v399_v4 }
 0x289   :  { %v452_v18 = vor.u32 1.1754944e-38, %v451_v10  ;;  %vm450_vm8 = vcmp.eq.f32.partialorder %v449_v12, 8.507059e+37 }
 0x28d   :  { %v982_v5 = vpop.eup %981 }
 0x28e   :  { %v441_v6 = vmul.f32 %v982_v5, %v399_v4  ;;  %v279_v7 = vpop.xlane.xlu1 %278  ;;  %vm446_vm5 = vweird.f32 %v982_v5 }
 0x28f   :  { %983 = vrcp.f32 %v279_v7  ;;  %v402_v8 = vpop.xlane.xlu2 %401  ;;  %vm447_vm7 = vmor %vm445_vm6, %vm446_vm5  ;;  %v434_v21 = vpop.f32.mrf.mxu1  ;;  %v323_v28 = vand.u32 2147483648, %v279_v7  ;;  %v321_v31 = vand.u32 2147483647, %v279_v7  ;;  %vm317_vm11 = vweird.f32 %v279_v7 }
 0x290   :  { %v442_v9 = vsub.f32 1.0, %v441_v6  ;;  %985 = vrcp.f32 %v402_v8  ;;  %v465_v32 = vand.u32 2147483648, %v402_v8  ;;  %v463_v36 = vand.u32 2147483647, %v402_v8 }
 0x291   :  { %v324_v40 = vor.u32 1.1754944e-38, %v323_v28  ;;  %vm459_vm13 = vweird.f32 %v402_v8  ;;  %vm322_vm14 = vcmp.eq.f32.partialorder %v321_v31, 8.507059e+37 }
 0x292   :  { %v443_v11 = vmul.f32 %v982_v5, %v442_v9  ;;  %v466_v43 = vor.u32 1.1754944e-38, %v465_v32  ;;  %vm464_vm2 = vcmp.eq.f32.partialorder %v463_v36, 8.507059e+37 }
 0x294   :  { %v444_v13 = vadd.f32 %v982_v5, %v443_v11  ;;  %v1263_v15 = vpop.xlane.xlu0 %535 }
 0x295   :  { %v984_v16 = vpop.eup %983  ;;  %987 = vrcp.f32 %v1263_v15  ;;  %v586_v56 = vand.u32 2147483648, %v1263_v15  ;;  %vm580_vm4 = vweird.f32 %v1263_v15  ;;  %v584_v58 = vand.u32 2147483647, %v1263_v15 }
 0x296   :  { %v986_v19 = vpop.eup %985  ;;  %v313_v20 = vmul.f32 %v984_v16, %v279_v7  ;;  %v448_v22 = vsel %vm447_vm7, %v982_v5, %v444_v13  ;;  %vm318_vm9 = vweird.f32 %v984_v16 }
 0x297   :  { %v453_v23 = vsel %vm450_vm8, %v452_v18, %v448_v22  ;;  %v455_v24 = vmul.f32 %v986_v19, %v402_v8  ;;  %vm460_vm10 = vweird.f32 %v986_v19  ;;  %vm319_vm12 = vmor %vm317_vm11, %vm318_vm9  ;;  %v587_v61 = vor.u32 1.1754944e-38, %v586_v56 }
 0x298   :  { %v314_v25 = vsub.f32 1.0, %v313_v20  ;;  %v468_v26 = vmul.f32 %v453_v23, %v434_v21  ;;  %vm461_vm15 = vmor %vm459_vm13, %vm460_vm10  ;;  %v437_v46 = vpop.f32.mrf.mxu1  ;;  %vm585_vm6 = vcmp.eq.f32.partialorder %v584_v58, 8.507059e+37 }
 0x299   :  { %v456_v29 = vsub.f32 1.0, %v455_v24 }
 0x29a   :  { %v315_v30 = vmul.f32 %v984_v16, %v314_v25  ;;  %472 = vrot.lane.b32.xlu0 %v468_v26, %s1032_s4 }
 0x29b   :  { %v988_v33 = vpop.eup %987  ;;  %v457_v34 = vmul.f32 %v986_v19, %v456_v29 }
 0x29c   :  { %v316_v37 = vadd.f32 %v984_v16, %v315_v30  ;;  %v576_v38 = vmul.f32 %v988_v33, %v1263_v15  ;;  %v539_v39 = vpop.xlane.xlu1 %538  ;;  %vm581_vm3 = vweird.f32 %v988_v33 }
 0x29d   :  { %v458_v41 = vadd.f32 %v986_v19, %v457_v34  ;;  %989 = vrcp.f32 %v539_v39  ;;  %vm582_vm5 = vmor %vm580_vm4, %vm581_vm3  ;;  %v600_v5 = vand.u32 2147483648, %v539_v39  ;;  %vm594_vm8 = vweird.f32 %v539_v39 }
 0x29e   :  { %v577_v42 = vsub.f32 1.0, %v576_v38  ;;  %v320_v44 = vsel %vm319_vm12, %v984_v16, %v316_v37  ;;  %v598_v7 = vand.u32 2147483647, %v539_v39 }
 0x29f   :  { %v462_v45 = vsel %vm461_vm15, %v986_v19, %v458_v41  ;;  %v325_v35 = vsel %vm322_vm14, %v324_v40, %v320_v44  ;;  %v601_v11 = vor.u32 1.1754944e-38, %v600_v5  ;;  %v1035_v5 = vmov 32.0  }
 0x2a0   :  { %v467_v47 = vsel %vm464_vm2, %v466_v43, %v462_v45  ;;  %v578_v48 = vmul.f32 %v988_v33, %v577_v42  ;;  %v340_v49 = vmul.f32 %v325_v35, %v306_v27  ;;  %vm599_vm12 = vcmp.eq.f32.partialorder %v598_v7, 8.507059e+37 }
 0x2a1   :  { %v469_v50 = vmul.f32 %v467_v47, %v437_v46 }
 0x2a2   :  { %342 = vst.msk [vmem:[#allocation2] sm:$0xff] %vm226_vm1, %v340_v49  ;;  %v579_v55 = vadd.f32 %v988_v33, %v578_v48  ;;  %v756_v48 = vld [vmem:[%s1321_s5 + $0x18] sm:$0xff]  ;;  %v755_v49 = vld [vmem:[%s1321_s5 + $0x10] sm:$0xff] }
 0x2a3   :  { %v990_v51 = vpop.eup %989  ;;  %474 = vrot.lane.b32.xlu0 %v469_v50, %s1032_s4  ;;  %v704_v24 = vpop.f32.mrf.mxu1  ;;  %929 = vmatpush.xpose.msk.msra.mxu2 %vm55_vm0, %v756_v48  ;;  %v754_v50 = vld [vmem:[%s1321_s5 + $0x8] sm:$0xff] }
 0x2a4   :  { %v590_v53 = vmul.f32 %v990_v51, %v539_v39  ;;  %v671_v54 = vpop.xlane.xlu1 %670  ;;  %v583_v59 = vsel %vm582_vm5, %v988_v33, %v579_v55  ;;  %vm595_vm7 = vweird.f32 %v990_v51 }
 0x2a5   :  { %991 = vrcp.f32 %v671_v54  ;;  %v588_v0 = vsel %vm585_vm6, %v587_v61, %v583_v59  ;;  %vm596_vm9 = vmor %vm594_vm8, %vm595_vm7  ;;  %v721_v9 = vand.u32 2147483648, %v671_v54  ;;  %v719_v12 = vand.u32 2147483647, %v671_v54 }
 0x2a6   :  { %v591_v57 = vsub.f32 1.0, %v590_v53  ;;  %vm715_vm11 = vweird.f32 %v671_v54 }
 0x2a7   :  { %v722_v19 = vor.u32 1.1754944e-38, %v721_v9  ;;  %vm720_vm14 = vcmp.eq.f32.partialorder %v719_v12, 8.507059e+37  ;;  %930 = vmatpush.xpose.msk.msra.mxu2 %vm55_vm0, %v755_v49 }
 0x2a8   :  { %v592_v60 = vmul.f32 %v990_v51, %v591_v57 }
 0x2aa   :  { %v593_v4 = vadd.f32 %v990_v51, %v592_v60  ;;  %v962_v60 = vld [vmem:[%s1322_s6] ss:$0 sm:$0xff] }
 0x2ab   :  { %v992_v62 = vpop.eup %991  ;;  %v569_v63 = vpop.f32.mrf.mxu3  ;;  %931 = vmatpush.xpose.msk.msra.mxu2 %vm55_vm0, %v754_v50 }
 0x2ac   :  { %v711_v1 = vmul.f32 %v992_v62, %v671_v54  ;;  %v603_v2 = vmul.f32 %v588_v0, %v569_v63  ;;  %v674_v3 = vpop.xlane.xlu1 %673  ;;  %v597_v10 = vsel %vm596_vm9, %v990_v51, %v593_v4  ;;  %vm716_vm10 = vweird.f32 %v992_v62  ;;  %v753_v51 = vld [vmem:[%s1321_s5] sm:$0xff] }
 0x2ad   :  { %993 = vrcp.f32 %v674_v3  ;;  %v602_v18 = vsel %vm599_vm12, %v601_v11, %v597_v10  ;;  %vm717_vm13 = vmor %vm715_vm11, %vm716_vm10  ;;  %v735_v27 = vand.u32 2147483648, %v674_v3  ;;  %v733_v30 = vand.u32 2147483647, %v674_v3  ;;  %v707_v37 = vpop.f32.mrf.mxu1 }
 0x2ae   :  { %v712_v6 = vsub.f32 1.0, %v711_v1  ;;  %607 = vrot.lane.b32.xlu1 %v603_v2, %s1033_s29  ;;  %vm729_vm2 = vweird.f32 %v674_v3  ;;  %vm613_vm9 = vcmask 195712   ;;  %vm748_vm10 = vcmask 261312  }
 0x2af   :  { %v736_v33 = vor.u32 1.1754944e-38, %v735_v27  ;;  %vm734_vm4 = vcmp.eq.f32.partialorder %v733_v30, 8.507059e+37  ;;  %932 = vmatpush.xpose.msk.msra.mxu2 %vm55_vm0, %v753_v51 }
 0x2b0   :  { %v713_v8 = vmul.f32 %v992_v62, %v712_v6 }
 0x2b2   :  { %v714_v13 = vadd.f32 %v992_v62, %v713_v8 }
 0x2b3   :  { %v994_v15 = vpop.eup %993  ;;  %v572_v16 = vpop.f32.mrf.mxu3 }
 0x2b4   :  { %v725_v20 = vmul.f32 %v994_v15, %v674_v3  ;;  %v604_v21 = vmul.f32 %v602_v18, %v572_v16  ;;  %v282_v22 = vpop.xlane.xlu1 %281  ;;  %v718_v23 = vsel %vm717_vm13, %v992_v62, %v714_v13  ;;  %vm730_vm15 = vweird.f32 %v994_v15 }
 0x2b5   :  { %995 = vrcp.f32 %v282_v22  ;;  %v723_v26 = vsel %vm720_vm14, %v722_v19, %v718_v23  ;;  %vm731_vm3 = vmor %vm729_vm2, %vm730_vm15  ;;  %v337_v41 = vand.u32 2147483648, %v282_v22  ;;  %v335_v43 = vand.u32 2147483647, %v282_v22 }
 0x2b6   :  { %v726_v25 = vsub.f32 1.0, %v725_v20  ;;  %609 = vrot.lane.b32.xlu1 %v604_v21, %s1033_s29  ;;  %v738_v28 = vmul.f32 %v723_v26, %v704_v24  ;;  %vm331_vm6 = vweird.f32 %v282_v22  ;;  %997 = vrcp.f32 %v1035_v5 }
 0x2b7   :  { %v338_v45 = vor.u32 1.1754944e-38, %v337_v41  ;;  %vm336_vm8 = vcmp.eq.f32.partialorder %v335_v43, 8.507059e+37 }
 0x2b8   :  { %v727_v29 = vmul.f32 %v994_v15, %v726_v25  ;;  %742 = vrot.lane.b32.xlu2 %v738_v28, %s1034_s30 }
 0x2ba   :  { %v728_v31 = vadd.f32 %v994_v15, %v727_v29 }
 0x2bb   :  { %v996_v32 = vpop.eup %995 }
 0x2bc   :  { %v732_v34 = vsel %vm731_vm3, %v994_v15, %v728_v31  ;;  %v327_v36 = vmul.f32 %v996_v32, %v282_v22  ;;  %vm332_vm5 = vweird.f32 %v996_v32  ;;  %v998_v6 = vpop.eup %997 }
 0x2bd   :  { %v737_v38 = vsel %vm734_vm4, %v736_v33, %v732_v34  ;;  %vm333_vm7 = vmor %vm331_vm6, %vm332_vm5  ;;  %v811_v7 = vmul.f32 32.0, %v998_v6  ;;  %vm815_vm11 = vweird.f32 %v998_v6  ;;  %v963_v34 = vld [vmem:[%s1323_s7] ss:$0 sm:$0xff]  ;;  %s1036_s7 = smov [#allocation3]  }
 0x2be   :  { %v739_v39 = vmul.f32 %v737_v38, %v707_v37  ;;  %v328_v40 = vsub.f32 1.0, %v327_v36  ;;  %v964_v38 = vld [vmem:[%s1324_s8] ss:$0 sm:$0xff]  ;;  %s873_s3 = sshll.u32 %s1036_s7, 4  ;;  %s875_s8 = sshll.u32 %s1325_s9, 4  ;;  %s874_s3 = int_to_ptr.vmem [resolvable:$true] %s873_s3  ;;  %s876_s8 = int_to_ptr.hbm [resolvable:$true] %s875_s8 }
 0x2bf   :  { %v812_v8 = vsub.f32 1.0, %v811_v7 }
 0x2c0   :  { %v329_v42 = vmul.f32 %v996_v32, %v328_v40  ;;  %744 = vrot.lane.b32.xlu0 %v739_v39, %s1034_s30 }
 0x2c1   :  { %v813_v9 = vmul.f32 %v998_v6, %v812_v8 }
 0x2c2   :  { %v330_v44 = vadd.f32 %v996_v32, %v329_v42 }
 0x2c3   :  { %v814_v10 = vadd.f32 %v998_v6, %v813_v9 }
 0x2c4   :  { %v334_v35 = vsel %vm333_vm7, %v996_v32, %v330_v44 }
 0x2c5   :  { %v339_v46 = vsel %vm336_vm8, %v338_v45, %v334_v35  ;;  %v816_v11 = vsel %vm815_vm11, %v998_v6, %v814_v10 }
 0x2c6   :  { %v341_v47 = vmul.f32 %v339_v46, %v1269_v52 }
 0x2c8   :  { %343 = vst.msk [vmem:[#allocation2 + $0x8] sm:$0xff] %vm226_vm1, %v341_v47  ;;  %vm478_vm1 = vcmask 130112  }
 0x30c   :  { %v473_v52 = vpop.permute.xlu0 %472 }
 0x30d   :  { %479 = vst.msk [vmem:[#allocation2] sm:$0xff] %vm478_vm1, %v473_v52 }
 0x312   :  { %v743_v55 = vpop.permute.xlu2 %742 }
 0x315   :  { %v475_v53 = vpop.permute.xlu0 %474 }
 0x316   :  { %480 = vst.msk [vmem:[#allocation2 + $0x8] sm:$0xff] %vm478_vm1, %v475_v53 }
 0x320   :  { %v608_v54 = vpop.permute.xlu1 %607 }
 0x321   :  { %614 = vst.msk [vmem:[#allocation2] sm:$0xff] %vm613_vm9, %v608_v54 }
 0x322   :  { %749 = vst.msk [vmem:[#allocation2] sm:$0xff] %vm748_vm10, %v743_v55 }
 0x328   :  { %v610_v56 = vpop.permute.xlu1 %609 }
 0x329   :  { %615 = vst.msk [vmem:[#allocation2 + $0x8] sm:$0xff] %vm613_vm9, %v610_v56  ;;  %v751_v57 = vld [vmem:[#allocation2] sm:$0xff] }
 0x32a   :  { %933 = vmatmul.msk.f32.vlgmr.msra.gmra.mxu2 %vm55_vm0, %v751_v57 }
 0x332   :  { %v745_v58 = vpop.permute.xlu0 %744 }
 0x333   :  { %750 = vst.msk [vmem:[#allocation2 + $0x8] sm:$0xff] %vm748_vm10, %v745_v58 }
 0x33a   :  { %v752_v59 = vld [vmem:[#allocation2 + $0x8] sm:$0xff] }
 0x33b   :  { %934 = vmatmul.msk.f32.gmra.mxu2 %vm55_vm0, %v752_v59 }
 0x3ad   :  { %v796_v61 = vpop.f32.mrf.mxu2 }
 0x3ae   :  { %v797_v62 = vadd.f32 %v962_v60, %v796_v61 }
 0x3b0   :  { %v802_v63 = vadd.f32 %v797_v62, %v1147_v14 }
 0x3b2   :  { %v804_v0 = vsel %vm55_vm0, %v802_v63, 0.0 }
 0x3b3   :  { %805 = vadd.xlane.f32.xlu2 %v804_v0 }
 0x3be   :  { %v799_v1 = vpop.f32.mrf.mxu2 }
 0x3bf   :  { %v800_v2 = vadd.f32 %v962_v60, %v799_v1 }
 0x3c1   :  { %v803_v3 = vadd.f32 %v800_v2, %v1162_v17 }
 0x3c3   :  { %v807_v4 = vsel %vm55_vm0, %v803_v3, 0.0 }
 0x3c4   :  { %808 = vadd.xlane.f32.xlu1 %v807_v4 }
 0x426   :  { %v806_v14 = vpop.xlane.xlu2 %805 }
 0x427   :  { %v817_v12 = vmul.f32 %v816_v11, %v806_v14 }
 0x429   :  { %v819_v13 = vsub.f32 %v802_v63, %v817_v12 }
 0x42b   :  { %v821_v15 = vmul.f32 %v819_v13, %v819_v13 }
 0x42d   :  { %v823_v16 = vsel %vm55_vm0, %v821_v15, 0.0 }
 0x42e   :  { %824 = vadd.xlane.f32.xlu0 %v823_v16 }
 0x437   :  { %v809_v17 = vpop.xlane.xlu1 %808 }
 0x438   :  { %v818_v18 = vmul.f32 %v816_v11, %v809_v17 }
 0x43a   :  { %v820_v19 = vsub.f32 %v803_v3, %v818_v18 }
 0x43c   :  { %v822_v20 = vmul.f32 %v820_v19, %v820_v19 }
 0x43e   :  { %v826_v21 = vsel %vm55_vm0, %v822_v20, 0.0 }
 0x43f   :  { %827 = vadd.xlane.f32.xlu2 %v826_v21 }
 0x4a1   :  { %v825_v22 = vpop.xlane.xlu0 %824 }
 0x4a2   :  { %v829_v23 = vmul.f32 %v825_v22, %v816_v11 }
 0x4a4   :  { %v831_v24 = vadd.f32 1e-05, %v829_v23 }
 0x4a6   :  { %999 = vrsqrt.f32 %v831_v24  ;;  %vm839_vm13 = vweird.f32 %v831_v24 }
 0x4ac   :  { %v1000_v25 = vpop.eup %999 }
 0x4ad   :  { %v834_v26 = vmul.f32 %v1000_v25, %v831_v24  ;;  %vm840_vm12 = vweird.f32 %v1000_v25 }
 0x4ae   :  { %vm841_vm14 = vmor %vm839_vm13, %vm840_vm12 }
 0x4af   :  { %v835_v27 = vmul.f32 %v1000_v25, %v834_v26 }
 0x4b1   :  { %v836_v28 = vmul.f32 0.5, %v835_v27 }
 0x4b2   :  { %v828_v29 = vpop.xlane.xlu2 %827 }
 0x4b3   :  { %v837_v30 = vsub.f32 1.5, %v836_v28  ;;  %v830_v31 = vmul.f32 %v828_v29, %v816_v11 }
 0x4b5   :  { %v838_v32 = vmul.f32 %v1000_v25, %v837_v30  ;;  %v832_v33 = vadd.f32 1e-05, %v830_v31 }
 0x4b7   :  { %v842_v36 = vsel %vm841_vm14, %v1000_v25, %v838_v32  ;;  %1001 = vrsqrt.f32 %v832_v33  ;;  %vm849_vm2 = vweird.f32 %v832_v33 }
 0x4b8   :  { %v853_v37 = vmul.f32 %v842_v36, %v819_v13 }
 0x4ba   :  { %v859_v39 = vmul.f32 %v963_v34, %v853_v37 }
 0x4bc   :  { %v865_v40 = vadd.f32 %v964_v38, %v859_v39 }
 0x4bd   :  { %v1002_v41 = vpop.eup %1001 }
 0x4be   :  { %v844_v42 = vmul.f32 %v1002_v41, %v832_v33  ;;  %867 = vst.msk [vmem:[#allocation3] sm:$0xff] %vm55_vm0, %v865_v40  ;;  %vm850_vm15 = vweird.f32 %v1002_v41 }
 0x4bf   :  { %vm851_vm3 = vmor %vm849_vm2, %vm850_vm15 }
 0x4c0   :  { %v845_v43 = vmul.f32 %v1002_v41, %v844_v42 }
 0x4c2   :  { %v846_v44 = vmul.f32 0.5, %v845_v43 }
 0x4c4   :  { %v847_v45 = vsub.f32 1.5, %v846_v44 }
 0x4c6   :  { %v848_v35 = vmul.f32 %v1002_v41, %v847_v45 }
 0x4c8   :  { %v852_v46 = vsel %vm851_vm3, %v1002_v41, %v848_v35 }
 0x4c9   :  { %v854_v47 = vmul.f32 %v852_v46, %v820_v19 }
 0x4cb   :  { %v860_v48 = vmul.f32 %v963_v34, %v854_v47 }
 0x4cd   :  { %v866_v49 = vadd.f32 %v964_v38, %v860_v48 }
 0x4cf   :  { %868 = vst.msk [vmem:[#allocation3 + $0x8] sm:$0xff] %vm55_vm0, %v866_v49 }
 0x4d0   :  { %881 = dma.vmem_to_hbm [thread:$0]  %s874_s3, 256, %s876_s8, [#allocation4], %s1037_s23, %s1037_s23, %s1032_s4  }
 0x4d1   :  { %1027 = dma.done.wait [#allocation4], 256  }
 0x4d2   :  { %1028 = vsyncadd [#allocation4], 4294967040 }
 0x4d3   :  { %886 = vsyncpa [#allocation4], 1 }

</bundles_post_ra>
